<compile_context>
chip_gen: v5e
topology: v5e:2x2
jax: 0.10.0
libtpu: 0.0.40
codegen_flags: <defaults>
</compile_context>

<pallas_src>
import jax
import jax.numpy as jnp
from jax.experimental import pallas as pl
from jax.experimental.pallas import tpu as pltpu


def _discriminator_loss_kernel(res_ref, gt_ref, mask_ref, out_ref,
                               num_acc, den_acc):
    h = pl.program_id(0)

    @pl.when(h == 0)
    def _init():
        num_acc[...] = jnp.zeros_like(num_acc)
        den_acc[...] = jnp.zeros_like(den_acc)

    res = res_ref[...].astype(jnp.float32)     # (B, C, TH, W)
    gt = gt_ref[...].astype(jnp.float32)
    mask = mask_ref[...].astype(jnp.float32)

    # nn.BCELoss(reduction='none'), including PyTorch's clamp of log at -100.
    # NOTE: two logs/element are inherent to general-target BCE (EUP cost is
    # irreducible without assuming binary targets).
    log_p = jnp.maximum(jnp.log(res), -100.0)
    log_q = jnp.maximum(jnp.log(1.0 - res), -100.0)
    bce = -(gt * log_p + (1.0 - gt) * log_q)

    # Partial sums over (channel, H-tile) -> per-(b, w) accumulators.
    masked = bce * mask
    num_acc[...] += jnp.sum(jnp.sum(masked, axis=1), axis=1)   # (B, W)
    den_acc[...] += jnp.sum(jnp.sum(mask, axis=1), axis=1)     # (B, W)

    @pl.when(h == pl.num_programs(0) - 1)
    def _finalize():
        # sample_loss = num / den per (b, w); mean over the (B, W) grid.
        out_ref[0, 0] = jnp.mean(num_acc[...] / den_acc[...])


def _pick_tile_h(B, C, H, W, itemsize, budget_bytes=12 << 20):
    """Largest multiple-of-8 divisor of H whose double-buffered input
    footprint (3 tensors) stays under `budget_bytes`; falls back to full H.
    The 12 MiB budget fits the scoped-VMEM defaults of v5e/v6e/v7x."""
    bytes_per_row = 3 * 2 * B * C * W * itemsize
    cap = max(1, budget_bytes // max(bytes_per_row, 1))
    best = None
    th = 8
    while th <= H:
        if H % th == 0 and th <= cap:
            best = th
        th += 8
    return best if best is not None else H


def discriminator_loss(res, gt, mask, *, tile_h=None):
    assert res.ndim == 4, "expects NCHW (B, C, H, W) inputs"
    B, C, H, W = res.shape
    itemsize = max(jnp.dtype(res.dtype).itemsize,
                   jnp.dtype(gt.dtype).itemsize,
                   jnp.dtype(mask.dtype).itemsize)
    th = tile_h if tile_h is not None else _pick_tile_h(B, C, H, W, itemsize)
    grid = (H // th,)

    def idx(h):
        return (0, 0, h, 0)

    out = pl.pallas_call(
        _discriminator_loss_kernel,
        out_shape=jax.ShapeDtypeStruct((1, 1), jnp.float32),
        grid_spec=pltpu.PrefetchScalarGridSpec(
            num_scalar_prefetch=0,
            grid=grid,
            in_specs=[
                pl.BlockSpec((B, C, th, W), idx),   # res
                pl.BlockSpec((B, C, th, W), idx),   # gt
                pl.BlockSpec((B, C, th, W), idx),   # mask
            ],
            out_specs=pl.BlockSpec((1, 1), lambda h: (0, 0),
                                   memory_space=pltpu.MemorySpace.SMEM),
            scratch_shapes=[
                pltpu.VMEM((B, W), jnp.float32),    # numerator accumulator
                pltpu.VMEM((B, W), jnp.float32),    # denominator accumulator
            ],
        ),
        compiler_params=pltpu.CompilerParams(
            # H is a reduction axis: accumulators carry across it.
            dimension_semantics=("arbitrary",),
        ),
    )(res, gt, mask)
    return out[0, 0]


def reference_loss(res, gt, mask):
    """Pure-JAX mirror of the PyTorch forward."""
    log_p = jnp.maximum(jnp.log(res), -100.0)
    log_q = jnp.maximum(jnp.log(1.0 - res), -100.0)
    bce = -(gt * log_p + (1.0 - gt) * log_q)
    l = bce * mask
    sample = l.sum(axis=(1, 2)) / mask.sum(axis=(1, 2))
    return jnp.mean(sample)


if __name__ == "__main__":
    key = jax.random.PRNGKey(0)
    k1, k2, k3 = jax.random.split(key, 3)

    B, C, H, W = 2, 1, 16, 128
    res = jax.random.uniform(k1, (B, C, H, W), jnp.float32, 0.05, 0.95)
    gt = (jax.random.uniform(k2, (B, C, H, W)) > 0.5).astype(jnp.float32)
    mask = (jax.random.uniform(k3, (B, C, H, W)) > 0.3).astype(jnp.float32)
    mask = mask.at[:, :, 0, :].set(1.0)   # ensure every (b, w) column is non-empty
    # TODO(synk): fully-masked (b, w) columns give den=0 -> inf/NaN, exactly as
    # in the PyTorch module; guard upstream for production data.

    # tile_h=8 forces a 2-step grid so the init/accumulate/finalize path runs.
    out = discriminator_loss(res, gt, mask, tile_h=8)
    jax.block_until_ready(out)

    ref = reference_loss(res, gt, mask)
    assert jnp.isfinite(out), out
    assert jnp.allclose(out, ref, rtol=1e-4, atol=1e-5), (out, ref)
    print("KERNEL_OK")
</pallas_src>

<mosaic_0001>
module attributes {stable_mosaic.version = 11 : i64} {
  func.func @_discriminator_loss_kernel(%arg0: i32, %arg1: memref<2x1x8x128xf32, #tpu.memory_space<vmem>>, %arg2: memref<2x1x8x128xf32, #tpu.memory_space<vmem>>, %arg3: memref<2x1x8x128xf32, #tpu.memory_space<vmem>>, %arg4: memref<1x1xf32, #tpu.memory_space<smem>>, %arg5: memref<2x128xf32, #tpu.memory_space<vmem>>, %arg6: memref<2x128xf32, #tpu.memory_space<vmem>>) attributes {dimension_semantics = [#tpu.dimension_semantics<arbitrary>], iteration_bounds = array<i64: 2>, scalar_prefetch = 0 : i64, scratch_operands = 2 : i64, tpu.core_type = #tpu.core_type<tc>, window_params = [{transform_indices = @transform_0, window_bounds = array<i64: 2, 1, 8, 128>}, {transform_indices = @transform_1, window_bounds = array<i64: 2, 1, 8, 128>}, {transform_indices = @transform_2, window_bounds = array<i64: 2, 1, 8, 128>}, {transform_indices = @transform_3, window_bounds = array<i64: 1, 1>}]} {
    %c0_i32 = arith.constant 0 : i32
    %0 = arith.cmpi eq, %arg0, %c0_i32 : i32
    %1 = arith.extui %0 : i1 to i32
    %c0_i32_0 = arith.constant 0 : i32
    %2 = arith.cmpi ne, %1, %c0_i32_0 : i32
    scf.if %2 {
      %cst_29 = arith.constant 0.000000e+00 : f32
      %35 = vector.broadcast %cst_29 : f32 to vector<2x128xf32>
      %c0_30 = arith.constant 0 : index
      %c0_31 = arith.constant 0 : index
      %36 = vector.load %arg5[%c0_30, %c0_31] : memref<2x128xf32, #tpu.memory_space<vmem>>, vector<2x128xf32>
      tpu.vector_store %arg5[%c0_30, %c0_31], %35 {strides = array<i32>} : memref<2x128xf32, #tpu.memory_space<vmem>>, vector<2x128xf32>,
      %cst_32 = arith.constant 0.000000e+00 : f32
      %37 = vector.broadcast %cst_32 : f32 to vector<2x128xf32>
      %c0_33 = arith.constant 0 : index
      %c0_34 = arith.constant 0 : index
      %38 = vector.load %arg6[%c0_33, %c0_34] : memref<2x128xf32, #tpu.memory_space<vmem>>, vector<2x128xf32>
      tpu.vector_store %arg6[%c0_33, %c0_34], %37 {strides = array<i32>} : memref<2x128xf32, #tpu.memory_space<vmem>>, vector<2x128xf32>,
    } else {
    }
    %c0 = arith.constant 0 : index
    %c0_1 = arith.constant 0 : index
    %c0_2 = arith.constant 0 : index
    %c0_3 = arith.constant 0 : index
    %3 = vector.load %arg1[%c0, %c0_1, %c0_2, %c0_3] : memref<2x1x8x128xf32, #tpu.memory_space<vmem>>, vector<2x1x8x128xf32>
    %c0_4 = arith.constant 0 : index
    %c0_5 = arith.constant 0 : index
    %c0_6 = arith.constant 0 : index
    %c0_7 = arith.constant 0 : index
    %4 = vector.load %arg2[%c0_4, %c0_5, %c0_6, %c0_7] : memref<2x1x8x128xf32, #tpu.memory_space<vmem>>, vector<2x1x8x128xf32>
    %c0_8 = arith.constant 0 : index
    %c0_9 = arith.constant 0 : index
    %c0_10 = arith.constant 0 : index
    %c0_11 = arith.constant 0 : index
    %5 = vector.load %arg3[%c0_8, %c0_9, %c0_10, %c0_11] : memref<2x1x8x128xf32, #tpu.memory_space<vmem>>, vector<2x1x8x128xf32>
    %6 = math.log %3 : vector<2x1x8x128xf32>
    %cst = arith.constant -1.000000e+02 : f32
    %7 = vector.broadcast %cst : f32 to vector<2x1x8x128xf32>
    %8 = arith.maximumf %6, %7 : vector<2x1x8x128xf32>
    %cst_12 = arith.constant 1.000000e+00 : f32
    %9 = vector.broadcast %cst_12 : f32 to vector<2x1x8x128xf32>
    %10 = arith.subf %9, %3 : vector<2x1x8x128xf32>
    %11 = math.log %10 : vector<2x1x8x128xf32>
    %cst_13 = arith.constant -1.000000e+02 : f32
    %12 = vector.broadcast %cst_13 : f32 to vector<2x1x8x128xf32>
    %13 = arith.maximumf %11, %12 : vector<2x1x8x128xf32>
    %14 = arith.mulf %4, %8 : vector<2x1x8x128xf32>
    %cst_14 = arith.constant 1.000000e+00 : f32
    %15 = vector.broadcast %cst_14 : f32 to vector<2x1x8x128xf32>
    %16 = arith.subf %15, %4 : vector<2x1x8x128xf32>
    %17 = arith.mulf %16, %13 : vector<2x1x8x128xf32>
    %18 = arith.addf %14, %17 : vector<2x1x8x128xf32>
    %cst_15 = arith.constant 0.000000e+00 : f32
    %19 = vector.broadcast %cst_15 : f32 to vector<2x1x8x128xf32>
    %20 = arith.subf %19, %18 : vector<2x1x8x128xf32>
    %21 = arith.mulf %20, %5 : vector<2x1x8x128xf32>
    %c0_16 = arith.constant 0 : index
    %c0_17 = arith.constant 0 : index
    %22 = vector.load %arg5[%c0_16, %c0_17] : memref<2x128xf32, #tpu.memory_space<vmem>>, vector<2x128xf32>
    %cst_18 = arith.constant dense<0.000000e+00> : vector<2x8x128xf32>
    %23 = vector.multi_reduction <add>, %21, %cst_18 [1] : vector<2x1x8x128xf32> to vector<2x8x128xf32>
    %cst_19 = arith.constant dense<0.000000e+00> : vector<2x128xf32>
    %24 = vector.multi_reduction <add>, %23, %cst_19 [1] : vector<2x8x128xf32> to vector<2x128xf32>
    %25 = arith.addf %22, %24 : vector<2x128xf32>
    %c0_20 = arith.constant 0 : index
    %c0_21 = arith.constant 0 : index
    %26 = vector.load %arg5[%c0_20, %c0_21] : memref<2x128xf32, #tpu.memory_space<vmem>>, vector<2x128xf32>
    tpu.vector_store %arg5[%c0_20, %c0_21], %25 {strides = array<i32>} : memref<2x128xf32, #tpu.memory_space<vmem>>, vector<2x128xf32>,
    %c0_22 = arith.constant 0 : index
    %c0_23 = arith.constant 0 : index
    %27 = vector.load %arg6[%c0_22, %c0_23] : memref<2x128xf32, #tpu.memory_space<vmem>>, vector<2x128xf32>
    %cst_24 = arith.constant dense<0.000000e+00> : vector<2x8x128xf32>
    %28 = vector.multi_reduction <add>, %5, %cst_24 [1] : vector<2x1x8x128xf32> to vector<2x8x128xf32>
    %cst_25 = arith.constant dense<0.000000e+00> : vector<2x128xf32>
    %29 = vector.multi_reduction <add>, %28, %cst_25 [1] : vector<2x8x128xf32> to vector<2x128xf32>
    %30 = arith.addf %27, %29 : vector<2x128xf32>
    %c0_26 = arith.constant 0 : index
    %c0_27 = arith.constant 0 : index
    %31 = vector.load %arg6[%c0_26, %c0_27] : memref<2x128xf32, #tpu.memory_space<vmem>>, vector<2x128xf32>
    tpu.vector_store %arg6[%c0_26, %c0_27], %30 {strides = array<i32>} : memref<2x128xf32, #tpu.memory_space<vmem>>, vector<2x128xf32>,
    %c1_i32 = arith.constant 1 : i32
    %32 = arith.cmpi eq, %arg0, %c1_i32 : i32
    %33 = arith.extui %32 : i1 to i32
    %c0_i32_28 = arith.constant 0 : i32
    %34 = arith.cmpi ne, %33, %c0_i32_28 : i32
    scf.if %34 {
      %c0_29 = arith.constant 0 : index
      %c0_30 = arith.constant 0 : index
      %35 = vector.load %arg5[%c0_29, %c0_30] : memref<2x128xf32, #tpu.memory_space<vmem>>, vector<2x128xf32>
      %c0_31 = arith.constant 0 : index
      %c0_32 = arith.constant 0 : index
      %36 = vector.load %arg6[%c0_31, %c0_32] : memref<2x128xf32, #tpu.memory_space<vmem>>, vector<2x128xf32>
      %37 = arith.divf %35, %36 : vector<2x128xf32>
      %38 = vector.shape_cast %37 : vector<2x128xf32> to vector<1x2x128xf32>
      %cst_33 = arith.constant dense<0.000000e+00> : vector<1xf32>
      %39 = vector.multi_reduction <add>, %38, %cst_33 [1, 2] : vector<1x2x128xf32> to vector<1xf32>
      %40 = vector.shape_cast %39 : vector<1xf32> to vector<1x1x1xf32>
      %41 = vector.extract %40[0, 0, 0] : f32 from vector<1x1x1xf32>
      %cst_34 = arith.constant 2.560000e+02 : f32
      %42 = arith.divf %41, %cst_34 : f32
      %c0_35 = arith.constant 0 : index
      %c0_36 = arith.constant 0 : index
      %43 = memref.load %arg4[%c0_35, %c0_36] : memref<1x1xf32, #tpu.memory_space<smem>>
      memref.store %42, %arg4[%c0_35, %c0_36] : memref<1x1xf32, #tpu.memory_space<smem>>
    } else {
    }
    return
  }
  func.func @transform_0(%arg0: i32) -> (i32, i32, i32, i32) {
    %c0_i32 = arith.constant 0 : i32
    %c0_i32_0 = arith.constant 0 : i32
    %c0_i32_1 = arith.constant 0 : i32
    %c0_i32_2 = arith.constant 0 : i32
    return %c0_i32, %c0_i32_0, %arg0, %c0_i32_1 : i32, i32, i32, i32
  }
  func.func @transform_1(%arg0: i32) -> (i32, i32, i32, i32) {
    %c0_i32 = arith.constant 0 : i32
    %c0_i32_0 = arith.constant 0 : i32
    %c0_i32_1 = arith.constant 0 : i32
    %c0_i32_2 = arith.constant 0 : i32
    return %c0_i32, %c0_i32_0, %arg0, %c0_i32_1 : i32, i32, i32, i32
  }
  func.func @transform_2(%arg0: i32) -> (i32, i32, i32, i32) {
    %c0_i32 = arith.constant 0 : i32
    %c0_i32_0 = arith.constant 0 : i32
    %c0_i32_1 = arith.constant 0 : i32
    %c0_i32_2 = arith.constant 0 : i32
    return %c0_i32, %c0_i32_0, %arg0, %c0_i32_1 : i32, i32, i32, i32
  }
  func.func @transform_3(%arg0: i32) -> (i32, i32) {
    %c0_i32 = arith.constant 0 : i32
    %c0_i32_0 = arith.constant 0 : i32
    %c0_i32_1 = arith.constant 0 : i32
    return %c0_i32, %c0_i32_0 : i32, i32
  }
}

</mosaic_0001>

<bundles_post_ra>
// kernel: tpu_custom_call.1
= control target key start
LH: loop header
LB: loop body
LE: loop exit
PB: predicated region body
PF: predicated region fallthrough
CT: control target
= control target key end

     0   :  { %8 = vsyncpa [#allocation5], 0  ;;  %s916_s0 = inlined_call_operand.hbm [shape: f32[2,1,16,128], index: 0, kind: input, shape index: {}]   ;;  %s917_s1 = inlined_call_operand.hbm [shape: f32[2,1,16,128], index: 1, kind: input, shape index: {}]   ;;  %s918_s2 = inlined_call_operand.hbm [shape: f32[2,1,16,128], index: 2, kind: input, shape index: {}]   ;;  %s919_s3 = inlined_call_operand.hbm [shape: f32[1,1], index: 3, kind: output, shape index: {}]  }
   0x1   :  { %10 = vsyncpa [#allocation5 + $0x1], 0 }
   0x2   :  { %11 = vsyncpa [#allocation8], 0 }
   0x3   :  { %13 = vsyncpa [#allocation8 + $0x1], 0 }
   0x4   :  { %14 = vsyncpa [#allocation6], 0  ;;  %s752_s12 = smov 0   ;;  %s754_s13 = smov 0  }
   0x5   :  { %s756_s14 = smov 0   ;;  %s758_s15 = smov 0  }
   0x6 LB: > { %s771_s16 = sadd.s32 4294967295, %s724_s15   ;;  %s774_s17 = sadd.s32 1, %s724_s15   ;;  %s724_s15 = sphi %s758_s15, %s926_s15   ;;  %s720_s14 = sphi %s756_s14, %s925_s14   ;;  %s716_s13 = sphi %s754_s13, %s924_s13   ;;  %s712_s12 = sphi %s752_s12, %s923_s12  }
   0x7   : > { %s24_s18 = ssub.s32 %s724_s15, %s774_s17  ;;  %s27_s19 = sadd.s32 1, %s720_s14 }
   0x8   : > { %p25_p0 = scmp.eq.s32.totalorder %s24_s18, 0  ;;  %p34_p1 = scmp.ne.s32.totalorder %s720_s14, %s716_s13 }
   0x9   : > { %p35_p2 = scmp.eq.s32.totalorder %s724_s15, 0  ;;  %p40_p3 = scmp.ne.s32.totalorder %s716_s13, %s712_s12 }
   0xa   : > { %s784_s20 = scalar_select %p25_p0, %s720_s14, %s27_s19  }
   0xb   : > { %p36_p4 = por %p35_p2, %p34_p1  ;;  %p41_p5 = scmp.eq.s32.totalorder %s771_s16, 0 }
   0xc   : > { %p525_p6 = scmp.lt.s32.totalorder %s724_s15, 2  ;;  %s137_s22 = sand.u32 1, %s720_s14  }
   0xd   : > { %p788_p7 = por %p41_p5, %p40_p3  ;;  %s795_s23 = sshll.u32 %s137_s22, 4 }
   0xe   : > { %s798_s24 = sshll.u32 %s724_s15, 3  ;;  %p800_p8 = pnand %p525_p6, %p36_p4 }
   0xf   : > { %s158_s26 = sand.u32 1, %s724_s15   ;;  %s166_s29 = scalar_lea.hbm %s917_s1, %s798_s24 }
  0x10   : > { %s162_s30 = scalar_lea.vmem [#allocation7], %s795_s23  ;;  %s167_s5 = sshll.u32 %s166_s29, 4  ;;  %s168_s5 = int_to_ptr.hbm [resolvable:$true] %s167_s5 }
  0x11   : > { %s169_s4 = sshll.u32 %s162_s30, 4  ;;  %p491_p9 = scmp.ge.s32.totalorder %s724_s15, 1  ;;  %s170_s4 = int_to_ptr.vmem [resolvable:$true] %s169_s4 }
  0x12   : > { %s811_s6 = scalar_lea.sflag [#allocation8], %s158_s26  ;;  %s578_s7 = sshra.s32 %s168_s5, 4  ;;  %s579_s7 = int_to_ptr.hbm [resolvable:$true] %s578_s7 }
  0x13   : > { %s580_s8 = scalar_lea.hbm %s579_s7, 16  ;;  %p582_p11 = pneg %p800_p8 }
  0x14   : > { %p581_p10 = scmp.ne.s32.totalorder %s579_s7, %s580_s8  ;;  %s585_s11 = scalar_lea.hbm %s917_s1, 32 }
  0x15   : > { %p586_p0 = scmp.lt.s32.totalorder %s579_s7, %s917_s1  ;;  %p587_p1 = scmp.lt.s32.totalorder %s585_s11, %s580_s8 }
  0x16   : > { %p583_p12 = pnand %p582_p11, %p581_p10 }
  0x17   : > { %p588_p2 = por %p587_p1, %p586_p0 }
  0x18   : > { %p584_p13 = pneg %p583_p12 }
  0x1a   : > { %p589_p3 = pnand %p588_p2, %p584_p13 }
  0x1c   : > { %592 = shalt.err (!%p589_p3)
}
  0x1d   : > { %s726_s19 = smov 256   ;;  %s727_s26 = smov 128  }
  0x1e   : > { %s728_s27 = smov 8   ;;  %p198_p4 = scmp.lt.s32.totalorder %s724_s15, 3 }
  0x1f   : > { %521 = dma.hbm_to_vmem [thread:$0]  (!%p800_p8), %s168_s5, 256, %s170_s4, %s811_s6, %s726_s19, %s727_s26, %s728_s27  }
  0x20   : > { %s145_s30 = scalar_lea.hbm %s916_s0, %s798_s24  ;;  %p837_p5 = pnand %p491_p9, %p198_p4 }
  0x21   : > { %s146_s8 = sshll.u32 %s145_s30, 4  ;;  %s141_s9 = scalar_lea.vmem [#allocation4], %s795_s23  ;;  %s147_s8 = int_to_ptr.hbm [resolvable:$true] %s146_s8 }
  0x22   : > { %s148_s10 = sshll.u32 %s141_s9, 4  ;;  %s138_s11 = scalar_lea.sflag [#allocation5], %s137_s22  ;;  %s149_s10 = int_to_ptr.vmem [resolvable:$true] %s148_s10 }
  0x23   : > { %s608_s12 = sshra.s32 %s147_s8, 4  ;;  %s615_s18 = scalar_lea.hbm %s916_s0, 32  ;;  %s609_s12 = int_to_ptr.hbm [resolvable:$true] %s608_s12 }
  0x24   : > { %s610_s4 = scalar_lea.hbm %s609_s12, 16  ;;  %p616_p9 = scmp.lt.s32.totalorder %s609_s12, %s916_s0 }
  0x25   : > { %p611_p6 = scmp.ne.s32.totalorder %s609_s12, %s610_s4  ;;  %p617_p13 = scmp.lt.s32.totalorder %s615_s18, %s610_s4 }
  0x27   : > { %p613_p10 = pnand %p611_p6, %p582_p11  ;;  %p618_p0 = por %p617_p13, %p616_p9 }
  0x29   : > { %p614_p12 = pneg %p613_p10 }
  0x2b   : > { %p619_p1 = pnand %p618_p0, %p614_p12 }
  0x2d   : > { %622 = shalt.err (!%p619_p1)
}
  0x2e   : > { %518 = dma.hbm_to_vmem [thread:$0]  (!%p800_p8), %s147_s8, 256, %s149_s10, %s138_s11, %s726_s19, %s727_s26, %s728_s27  }
  0x2f   : > { %s187_s9 = scalar_lea.hbm %s918_s2, %s798_s24  ;;  %s183_s15 = scalar_lea.vmem [#allocation9], %s795_s23 }
  0x30   : > { %s190_s5 = sshll.u32 %s183_s15, 4  ;;  %s188_s12 = sshll.u32 %s187_s9, 4  ;;  %s191_s5 = int_to_ptr.vmem [resolvable:$true] %s190_s5  ;;  %s189_s12 = int_to_ptr.hbm [resolvable:$true] %s188_s12 }
  0x31   : > { %s638_s4 = sshra.s32 %s189_s12, 4  ;;  %s645_s8 = scalar_lea.hbm %s918_s2, 32  ;;  %s639_s4 = int_to_ptr.hbm [resolvable:$true] %s638_s4 }
  0x32   : > { %s640_s18 = scalar_lea.hbm %s639_s4, 16  ;;  %p646_p6 = scmp.lt.s32.totalorder %s639_s4, %s918_s2 }
  0x33   : > { %p641_p2 = scmp.ne.s32.totalorder %s639_s4, %s640_s18  ;;  %p647_p10 = scmp.lt.s32.totalorder %s645_s8, %s640_s18 }
  0x35   : > { %p643_p3 = pnand %p641_p2, %p582_p11  ;;  %p648_p12 = por %p647_p10, %p646_p6 }
  0x37   : > { %p644_p4 = pneg %p643_p3 }
  0x39   : > { %p649_p9 = pnand %p648_p12, %p644_p4 }
  0x3b   : > { %652 = shalt.err (!%p649_p9)
}
  0x3c   : > { %524 = dma.hbm_to_vmem [thread:$0]  (!%p800_p8), %s189_s12, 256, %s191_s5, %s811_s6, %s726_s19, %s727_s26, %s728_s27  }
  0x3d   : > { %202 = sbr.rel (%p837_p5) target bundleno = 328 (0x148), region = 32  ;;  %s204_s23 = sand.u32 (!%p837_p5), 1, %s716_s13  }
  0x3e   : > { %s881_s24 = sshll.u32 (!%p837_p5), %s204_s23, 4  ;;  %s205_s22 = scalar_lea.sflag (!%p837_p5), [#allocation5], %s204_s23 }
  0x3f   : > { %s208_s30 = scalar_lea.vmem (!%p837_p5), [#allocation4], %s881_s24 }
  0x42   : > { %699 = dma.done.wait (%p788_p7), %s205_s22, 256  }
  0x43   : > { %701 = vsyncadd (%p788_p7), %s205_s22, 4294967040  ;;  %s214_s25 = sand.u32 1, %s771_s16   ;;  %s218_s19 = scalar_lea.vmem [#allocation7], %s881_s24 }
  0x44   : > { %s215_s6 = scalar_lea.sflag [#allocation8], %s214_s25 }
  0x45   : > { %703 = dma.done.wait (%p788_p7), %s215_s6, 512  }
  0x46   : > { %705 = vsyncadd (%p788_p7), %s215_s6, 4294966784  ;;  %s228_s26 = scalar_lea.vmem [#allocation9], %s881_s24  ;;  %p495_p8 = scmp.ne.s32.totalorder %s771_s16, 0 }
  0x48   : > { %260 = sbr.rel (%p495_p8) target bundleno = 80 (0x50), region = 48 }
  0x4d   : > { %v729_v0 = vmov 0.0  }
  0x4e   : > { %261 = vst [vmem:[#allocation2] sm:$0x3] %v729_v0 }
  0x4f   : > { %262 = vst [vmem:[#allocation3] sm:$0x3] %v729_v0 }
  0x50 PF: > { %v263_v1 = vld [vmem:[%s208_s30] sm:$0xff]  ;;  %v264_v2 = vld [vmem:[%s208_s30 + $0x8] sm:$0xff]  ;;  %vm312_vm0 = vcmask 1041409   ;;  %p496_p7 = scmp.ne.s32.totalorder %s771_s16, 1 }
  0x51   : > { %v267_v3 = vld [vmem:[%s228_s26] sm:$0xff]  ;;  %566 = vlog2.f32 %v263_v1  ;;  %v275_v4 = vsub.f32 1.0, %v263_v1  ;;  %v276_v5 = vsub.f32 1.0, %v264_v2  ;;  %v268_v6 = vld [vmem:[%s228_s26 + $0x8] sm:$0xff] }
  0x52   : > { %568 = vlog2.f32 %v264_v2  ;;  %v320_v7 = vrot.slane %v267_v3, 4  ;;  %v326_v8 = vrot.slane %v268_v6, 4  ;;  %v265_v13 = vld [vmem:[%s218_s19] sm:$0xff]  ;;  %v266_v16 = vld [vmem:[%s218_s19 + $0x8] sm:$0xff] }
  0x53   : > { %570 = vlog2.f32 %v275_v4  ;;  %v285_v25 = vsub.f32 1.0, %v265_v13  ;;  %v286_v29 = vsub.f32 1.0, %v266_v16 }
  0x54   : > { %572 = vlog2.f32 %v276_v5  ;;  %v321_v9 = vadd.f32 %v320_v7, %v267_v3  ;;  %v327_v10 = vadd.f32 %v326_v8, %v268_v6 }
  0x55   : > { %v295_v59 = vld [vmem:[#allocation2] sm:$0x3] }
  0x56   : > { %v322_v11 = vrot.slane %v321_v9, 2  ;;  %v328_v14 = vrot.slane %v327_v10, 2  ;;  %v317_v36 = vld [vmem:[#allocation3] sm:$0x3] }
  0x57   : > { %v567_v12 = vpop.eup %566 }
  0x58   : > { %v569_v15 = vpop.eup %568  ;;  %v270_v17 = vmul.f32 0.6931472, %v567_v12  ;;  %v323_v18 = vadd.f32 %v322_v11, %v321_v9  ;;  %v329_v21 = vadd.f32 %v328_v14, %v327_v10 }
  0x59   : > { %v571_v19 = vpop.eup %570  ;;  %v272_v20 = vmul.f32 0.6931472, %v569_v15 }
  0x5a   : > { %v573_v22 = vpop.eup %572  ;;  %v273_v23 = vmax.f32 %v270_v17, -100.0  ;;  %v278_v24 = vmul.f32 0.6931472, %v571_v19  ;;  %v324_v26 = vrot.slane %v323_v18, 1  ;;  %v330_v30 = vrot.slane %v329_v21, 1 }
  0x5b   : > { %v274_v27 = vmax.f32 %v272_v20, -100.0  ;;  %v280_v28 = vmul.f32 0.6931472, %v573_v22 }
  0x5c   : > { %v281_v31 = vmax.f32 %v278_v24, -100.0  ;;  %v283_v32 = vmul.f32 %v273_v23, %v265_v13  ;;  %v325_v33 = vadd.f32 %v324_v26, %v323_v18  ;;  %v331_v37 = vadd.f32 %v330_v30, %v329_v21 }
  0x5d   : > { %v282_v34 = vmax.f32 %v280_v28, -100.0  ;;  %v284_v35 = vmul.f32 %v274_v27, %v266_v16 }
  0x5e   : > { %v287_v38 = vmul.f32 %v285_v25, %v281_v31  ;;  %v334_v40 = vsel %vm312_vm0, %v331_v37, %v325_v33 }
  0x5f   : > { %v288_v39 = vmul.f32 %v286_v29, %v282_v34  ;;  %v336_v42 = vadd.f32 %v334_v40, %v317_v36 }
  0x60   : > { %v289_v41 = vadd.f32 %v287_v38, %v283_v32 }
  0x61   : > { %v290_v43 = vadd.f32 %v288_v39, %v284_v35  ;;  %337 = vst [vmem:[#allocation3] sm:$0x3] %v336_v42 }
  0x62   : > { %v291_v44 = vsub.f32 0.0, %v289_v41 }
  0x63   : > { %v292_v45 = vsub.f32 0.0, %v290_v43 }
  0x64   : > { %v293_v46 = vmul.f32 %v291_v44, %v267_v3 }
  0x65   : > { %v294_v47 = vmul.f32 %v292_v45, %v268_v6 }
  0x66   : > { %v298_v48 = vrot.slane %v293_v46, 4 }
  0x67   : > { %v304_v49 = vrot.slane %v294_v47, 4 }
  0x68   : > { %v299_v50 = vadd.f32 %v298_v48, %v293_v46 }
  0x69   : > { %v305_v51 = vadd.f32 %v304_v49, %v294_v47 }
  0x6a   : > { %v300_v52 = vrot.slane %v299_v50, 2 }
  0x6b   : > { %v306_v53 = vrot.slane %v305_v51, 2 }
  0x6c   : > { %v301_v54 = vadd.f32 %v300_v52, %v299_v50 }
  0x6d   : > { %v307_v55 = vadd.f32 %v306_v53, %v305_v51 }
  0x6e   : > { %v302_v56 = vrot.slane %v301_v54, 1 }
  0x6f   : > { %v308_v57 = vrot.slane %v307_v55, 1 }
  0x70   : > { %v303_v58 = vadd.f32 %v302_v56, %v301_v54 }
  0x71   : > { %v309_v60 = vadd.f32 %v308_v57, %v307_v55 }
  0x72   : > { %341 = sbr.rel (%p496_p7) target bundleno = 322 (0x142), region = 52 }
  0x73   : > { %v313_v61 = vsel %vm312_vm0, %v309_v60, %v303_v58 }
  0x74   : > { %v315_v62 = vadd.f32 %v313_v61, %v295_v59 }
  0x76   : > { %316 = vst [vmem:[#allocation2] sm:$0x3] %v315_v62 }
  0x77   : > { %v343_v63 = vld [vmem:[#allocation3] sm:$0x3]  ;;  %vm359_vm5 = vcmask 1041408   ;;  %v730_v13 = vmov 256.0  }
  0x78   : > { %574 = vrcp.f32 %v343_v63  ;;  %v355_v2 = vand.u32 2147483648, %v343_v63  ;;  %vm349_vm1 = vweird.f32 %v343_v63  ;;  %v353_v4 = vand.u32 2147483647, %v343_v63 }
  0x79   : > { %576 = vrcp.f32 %v730_v13 }
  0x7a   : > { %v356_v6 = vor.u32 1.1754944e-38, %v355_v2  ;;  %vm354_vm4 = vcmp.eq.f32.partialorder %v353_v4, 8.507059e+37 }
  0x7d   : > { %v342_v8 = vld [vmem:[#allocation2] sm:$0x3] }
  0x7e   : > { %v575_v0 = vpop.eup %574 }
  0x7f   : > { %v345_v1 = vmul.f32 %v575_v0, %v343_v63  ;;  %vm350_vm2 = vweird.f32 %v575_v0  ;;  %v577_v14 = vpop.eup %576 }
  0x80   : > { %vm351_vm3 = vmor %vm349_vm1, %vm350_vm2  ;;  %v371_v15 = vmul.f32 256.0, %v577_v14  ;;  %vm375_vm6 = vweird.f32 %v577_v14 }
  0x81   : > { %v346_v3 = vsub.f32 1.0, %v345_v1 }
  0x82   : > { %v372_v16 = vsub.f32 1.0, %v371_v15 }
  0x83   : > { %v347_v5 = vmul.f32 %v575_v0, %v346_v3 }
  0x84   : > { %v373_v20 = vmul.f32 %v577_v14, %v372_v16 }
  0x85   : > { %v348_v7 = vadd.f32 %v575_v0, %v347_v5 }
  0x86   : > { %v374_v23 = vadd.f32 %v577_v14, %v373_v20 }
  0x87   : > { %v352_v9 = vsel %vm351_vm3, %v575_v0, %v348_v7 }
  0x88   : > { %v357_v10 = vsel %vm354_vm4, %v356_v6, %v352_v9  ;;  %v376_v26 = vsel %vm375_vm6, %v577_v14, %v374_v23 }
  0x89   : > { %v358_v11 = vmul.f32 %v357_v10, %v342_v8 }
  0x8b   : > { %v360_v12 = vsel %vm359_vm5, %v358_v11, 0.0 }
  0x8c   : > { %361 = vadd.xlane.f32.xlu0 %v360_v12 }
  0xff   : > { %v362_v17 = vpop.xlane.xlu0 %361 }
 0x100   : > { %v363_v18 = vrot.slane %v362_v17, 4 }
 0x102   : > { %v364_v19 = vadd.f32 %v363_v18, %v362_v17 }
 0x104   : > { %v365_v21 = vrot.slane %v364_v19, 2 }
 0x106   : > { %v366_v22 = vadd.f32 %v365_v21, %v364_v19 }
 0x108   : > { %v367_v24 = vrot.slane %v366_v22, 1 }
 0x10a   : > { %v368_v25 = vadd.f32 %v367_v24, %v366_v22 }
 0x10c   : > { %501 = vpush %v368_v25 }
 0x10d   : > { %503 = vpush %v376_v26 }
 0x13d   : > { %s502_s21 = spop %501 }
 0x13e   : > { %s504_s27 = spop %503 }
 0x13f   : > { %s378_s7 = smul.f32 %s504_s27, %s502_s21 }
 0x141   : > { %380 = sst [smem:[#allocation10]] %s378_s7 }
 0x142 PF: > { %p526_p11 = scmp.eq.s32.totalorder %s771_s16, 1  ;;  %s387_s5 = sshll.u32 %s919_s3, 4  ;;  %s388_s5 = int_to_ptr.hbm [resolvable:$true] %s387_s5 }
 0x143   : > { %s731_s12 = smov [#allocation10]  }
 0x144   : > { %512 = dma.smem_to_hbm (%p526_p11), %s731_s12, 16, %s388_s5, [#allocation6]  }
 0x145   : > { %707 = dma.done.wait (%p526_p11), [#allocation6], 16  }
 0x146   : > { %709 = vsyncadd (%p526_p11), [#allocation6], 4294967280 }
 0x147   : > { %396 = sfence }
 0x148 PF: > { %p17_p5 = scmp.ge.s32.totalorder %s774_s17, 4   ;;  %s923_s12 = smov %s716_s13 }
 0x149   : > { %s924_s13 = smov %s720_s14  ;;  %s925_s14 = smov %s784_s20 }
 0x14a   : > { %s926_s15 = smov %s774_s17  ;;  %19 = sbr.rel (!%p17_p5) target bundleno = 6 (0x6), region = 102 }
 0x14f   :  { %402 = vsyncpa [#allocation5], 1 }
 0x150   :  { %404 = vsyncpa [#allocation5 + $0x1], 1 }
 0x151   :  { %405 = vsyncpa [#allocation8], 1 }
 0x152   :  { %407 = vsyncpa [#allocation8 + $0x1], 1 }
 0x153   :  { %408 = vsyncpa [#allocation6], 1 }
 0x154   :  { %410 = vsyncpa [#allocation6 + $0x1], 1 }

</bundles_post_ra>
